<compile_context>
chip_gen: v6e
topology: v6e:2x2x1
jax: 0.10.0
libtpu: 0.0.40
codegen_flags: <defaults>
</compile_context>

<pallas_src>
import jax
import jax.numpy as jnp
from jax.experimental import pallas as pl
from jax.experimental.pallas import tpu as pltpu

MIN_TRACK_LEN_FOR_SMOOTHING = 4

# Max rows-of-B per block; multiple of 8 so tiled blocks satisfy the sublane
# constraint.  Small T*D keeps per-block bytes tiny, so this comfortably
# double-buffers on v5e (16 MiB scoped) and v7x (64 MiB physical) alike.
_MAX_B_TILE = 512


def _smooth_track_kernel(init_ref, smooth_ref, pos_out_ref):
    # init_ref:    (TB, D)        frozen first position (flattened time slice)
    # smooth_ref:  (TB, (T-1)*D)  learnable positions (flattened)
    # pos_out_ref: (TB, T*D)      = concat([init, smooth], axis=-1)
    #
    # Build the concatenated tile in vregs, then do ONE aligned full-block
    # store (no sublane-misaligned pl.ds writes, no masked partial stores).
    pos_out_ref[...] = jnp.concatenate(
        [
            init_ref[...].astype(pos_out_ref.dtype),
            smooth_ref[...].astype(pos_out_ref.dtype),
        ],
        axis=-1,
    )


def batched_smooth_track_forward(initial_pos, smooth_pos, smooth_rot):
    """Pallas equivalent of BatchedSmoothTrack.forward().

    Args:
      initial_pos: (B, 1, D)   float  -- observed_pos[:, [0]] (frozen)
      smooth_pos:  (B, T-1, D) float  -- parameter (observed_pos[:, 1:])
      smooth_rot:  (B, T)      float  -- parameter (observed_yaw)

    Returns:
      pos: (B, T, D) float32
      rot: (B, T)    float32
    """
    B, _, D = initial_pos.shape
    Tm1 = smooth_pos.shape[1]
    T = Tm1 + 1
    assert T >= MIN_TRACK_LEN_FOR_SMOOTHING, (
        f"for jerk, need at least {MIN_TRACK_LEN_FOR_SMOOTHING} positions"
    )
    assert smooth_rot.shape == (B, T), smooth_rot.shape

    # Lane-dense flattening (pure layout change; concat over T == concat over
    # the flattened T*D axis for row-major contiguous data).
    init_flat = initial_pos.reshape(B, D)
    smooth_flat = smooth_pos.reshape(B, Tm1 * D)

    # Tile over B.  TB == B (full extent) is always legal; otherwise TB must
    # be a multiple of 8 for the second-to-last block dim.
    if B <= _MAX_B_TILE:
        tb = B
    else:
        tb = _MAX_B_TILE
    grid = (pl.cdiv(B, tb),)

    pos_flat = pl.pallas_call(
        _smooth_track_kernel,
        out_shape=jax.ShapeDtypeStruct((B, T * D), jnp.float32),
        grid=grid,
        in_specs=[
            pl.BlockSpec((tb, D), lambda i: (i, 0)),
            pl.BlockSpec((tb, Tm1 * D), lambda i: (i, 0)),
        ],
        out_specs=pl.BlockSpec((tb, T * D), lambda i: (i, 0)),
        compiler_params=pltpu.CompilerParams(
            dimension_semantics=("parallel",),
        ),
    )(init_flat, smooth_flat)

    pos = pos_flat.reshape(B, T, D)
    # rot is a pure identity (plus no-op cast when already f32): no kernel.
    rot = smooth_rot.astype(jnp.float32)
    return pos, rot


class BatchedSmoothTrackJax:
    """Mirror of the PyTorch module's __init__/forward using the Pallas kernel."""

    def __init__(self, batched_observed_track_pos, batched_observed_track_yaw_angle_rad,
                 time_between_frames_s):
        assert batched_observed_track_pos.ndim == 3, batched_observed_track_pos.shape
        assert batched_observed_track_pos.shape[1] >= MIN_TRACK_LEN_FOR_SMOOTHING, (
            f"for jerk, need at least {MIN_TRACK_LEN_FOR_SMOOTHING} positions"
        )
        # frozen buffer (detached in torch)
        self.initial_pos = jax.lax.stop_gradient(
            batched_observed_track_pos[:, 0:1].astype(jnp.float32)
        )
        # "parameters" (deterministically initialized from the observed track)
        self._smooth_pos = batched_observed_track_pos[:, 1:, :].astype(jnp.float32)
        self.smooth_rot = batched_observed_track_yaw_angle_rad.astype(jnp.float32)
        self.time_between_frames_s = time_between_frames_s

    def forward(self):
        return batched_smooth_track_forward(
            self.initial_pos, self._smooth_pos, self.smooth_rot
        )


if __name__ == "__main__":
    # Small deterministic example: B=2 tracks, T=8 timesteps, D=3 (x, y, z).
    key = jax.random.PRNGKey(0)
    k_pos, k_yaw = jax.random.split(key)
    B, T, D = 2, 8, 3
    observed_pos = jax.random.normal(k_pos, (B, T, D), dtype=jnp.float32)
    observed_yaw = jax.random.uniform(
        k_yaw, (B, T), dtype=jnp.float32, minval=-jnp.pi, maxval=jnp.pi
    )

    module = BatchedSmoothTrackJax(observed_pos, observed_yaw, time_between_frames_s=0.1)
    pos, rot = module.forward()
    jax.block_until_ready(pos)
    jax.block_until_ready(rot)

    # sanity check vs. pure-JAX reference of the torch forward()
    ref_pos = jnp.concatenate([observed_pos[:, 0:1], observed_pos[:, 1:]], axis=1)
    assert pos.shape == (B, T, D) and rot.shape == (B, T)
    assert jnp.array_equal(pos, ref_pos)
    assert jnp.array_equal(rot, observed_yaw)

    # also exercise a larger, tiled case (multiple B-blocks, parallel grid)
    B2, T2 = 1537, 12  # non-multiple of the tile to exercise the ragged edge
    kp2, ky2 = jax.random.split(jax.random.PRNGKey(1))
    obs_pos2 = jax.random.normal(kp2, (B2, T2, D), dtype=jnp.float32)
    obs_yaw2 = jax.random.normal(ky2, (B2, T2), dtype=jnp.float32)
    pos2, rot2 = batched_smooth_track_forward(
        obs_pos2[:, 0:1], obs_pos2[:, 1:], obs_yaw2
    )
    jax.block_until_ready(pos2)
    assert jnp.array_equal(pos2, obs_pos2)
    assert jnp.array_equal(rot2, obs_yaw2)

    print("KERNEL_OK")
</pallas_src>

<mosaic_0001>
module attributes {stable_mosaic.version = 11 : i64} {
  func.func @_smooth_track_kernel(%arg0: i32, %arg1: memref<2x3xf32, #tpu.memory_space<vmem>>, %arg2: memref<2x21xf32, #tpu.memory_space<vmem>>, %arg3: memref<2x24xf32, #tpu.memory_space<vmem>>) attributes {dimension_semantics = [#tpu.dimension_semantics<parallel>], iteration_bounds = array<i64: 1>, scalar_prefetch = 0 : i64, scratch_operands = 0 : i64, tpu.core_type = #tpu.core_type<tc>, window_params = [{transform_indices = @transform_0, window_bounds = array<i64: 2, 3>}, {transform_indices = @transform_1, window_bounds = array<i64: 2, 21>}, {transform_indices = @transform_2, window_bounds = array<i64: 2, 24>}]} {
    %c0 = arith.constant 0 : index
    %c0_0 = arith.constant 0 : index
    %0 = vector.load %arg1[%c0, %c0_0] : memref<2x3xf32, #tpu.memory_space<vmem>>, vector<2x3xf32>
    %c0_1 = arith.constant 0 : index
    %c0_2 = arith.constant 0 : index
    %1 = vector.load %arg2[%c0_1, %c0_2] : memref<2x21xf32, #tpu.memory_space<vmem>>, vector<2x21xf32>
    %2 = tpu.concatenate %0, %1 in 1 : vector<2x3xf32>, vector<2x21xf32> -> vector<2x24xf32>
    %c0_3 = arith.constant 0 : index
    %c0_4 = arith.constant 0 : index
    %3 = vector.load %arg3[%c0_3, %c0_4] : memref<2x24xf32, #tpu.memory_space<vmem>>, vector<2x24xf32>
    tpu.vector_store %arg3[%c0_3, %c0_4], %2 {strides = array<i32>} : memref<2x24xf32, #tpu.memory_space<vmem>>, vector<2x24xf32>,
    return
  }
  func.func @transform_0(%arg0: i32) -> (i32, i32) {
    %c0_i32 = arith.constant 0 : i32
    %c0_i32_0 = arith.constant 0 : i32
    return %arg0, %c0_i32 : i32, i32
  }
  func.func @transform_1(%arg0: i32) -> (i32, i32) {
    %c0_i32 = arith.constant 0 : i32
    %c0_i32_0 = arith.constant 0 : i32
    return %arg0, %c0_i32 : i32, i32
  }
  func.func @transform_2(%arg0: i32) -> (i32, i32) {
    %c0_i32 = arith.constant 0 : i32
    %c0_i32_0 = arith.constant 0 : i32
    return %arg0, %c0_i32 : i32, i32
  }
}

</mosaic_0001>

<bundles_post_ra>
// kernel: tpu_custom_call.1
= control target key start
LH: loop header
LB: loop body
LE: loop exit
PB: predicated region body
PF: predicated region fallthrough
CT: control target
= control target key end

     0   :  { %7 = vsyncpa [#allocation3], 0  ;;  %s160_s0 = inlined_call_operand.hbm [shape: f32[2,3], index: 0, kind: input, shape index: {}]   ;;  %s161_s1 = inlined_call_operand.hbm [shape: f32[2,21], index: 1, kind: input, shape index: {}]   ;;  %s162_s2 = inlined_call_operand.hbm [shape: f32[2,24], index: 2, kind: output, shape index: {}]  }
   0x1   :  { %8 = vsyncpa [#allocation6], 0 }
   0x2   :  { %9 = vsyncpa [#allocation4], 0  ;;  %s132_s9 = smov [#allocation2]   ;;  %s133_s11 = smov [#allocation5]  }
   0x3   :  { %s16_s10 = sshll.u32 %s132_s9, 4  ;;  %s26_s12 = sshll.u32 %s133_s11, 4  ;;  %s17_s10 = int_to_ptr.vmem [resolvable:$true] %s16_s10  ;;  %s27_s12 = int_to_ptr.vmem [resolvable:$true] %s26_s12 }
   0x4   :  { %s74_s13 = scalar_lea.vmem %s17_s10, 32  ;;  %p79_p1 = scmp.lt.s32.totalorder %s17_s10, %s17_s10 }
   0x5   :  { %p75_p0 = scmp.ne.s32.totalorder %s17_s10, %s74_s13  ;;  %p80_p2 = scmp.lt.s32.totalorder %s74_s13, %s74_s13 }
   0x7   :  { %p81_p3 = por %p80_p2, %p79_p1 }
   0x9   :  { %p82_p4 = pnand %p81_p3, %p75_p0 }
   0xb   :  { %85 = shalt.err (!%p82_p4)
}
   0xc   :  { %19 = dma.hbm_to_vmem [thread:$0]  %s160_s0, 32, %s17_s10, [#allocation3]  }
   0xd   :  { %s94_s16 = scalar_lea.vmem %s27_s12, 32  ;;  %p99_p6 = scmp.lt.s32.totalorder %s27_s12, %s27_s12 }
   0xe   :  { %p95_p5 = scmp.ne.s32.totalorder %s27_s12, %s94_s16  ;;  %p100_p7 = scmp.lt.s32.totalorder %s94_s16, %s94_s16 }
  0x10   :  { %p101_p8 = por %p100_p7, %p99_p6 }
  0x12   :  { %p102_p9 = pnand %p101_p8, %p95_p5 }
  0x14   :  { %105 = shalt.err (!%p102_p9)
}
  0x15   :  { %29 = dma.hbm_to_vmem [thread:$0]  %s161_s1, 32, %s27_s12, [#allocation6]  }
  0x16   :  { %126 = dma.done.wait [#allocation3], 32  }
  0x17   :  { %127 = vsyncadd [#allocation3], 4294967264 }
  0x18   :  { %128 = dma.done.wait [#allocation6], 32  }
  0x19   :  { %129 = vsyncadd [#allocation6], 4294967264  ;;  %v37_v0 = vld [vmem:[#allocation5] sm:$0x3]  ;;  %s134_s19 = smov 3   ;;  %s135_s20 = smov [#allocation7]  }
  0x1a   :  { %39 = vrot.lane.b32.xlu0 %v37_v0, %s134_s19  ;;  %s52_s0 = sshll.u32 %s135_s20, 4  ;;  %v36_v1 = vld [vmem:[#allocation2] sm:$0x3]  ;;  %vm42_vm0 = vcmask 23552   ;;  %vm44_vm1 = vcmask 189440   ;;  %s53_s0 = int_to_ptr.vmem [resolvable:$true] %s52_s0 }
  0x1b   :  { %s106_s21 = scalar_lea.vmem %s53_s0, 32  ;;  %p111_p11 = scmp.lt.s32.totalorder %s53_s0, %s53_s0 }
  0x1c   :  { %p107_p10 = scmp.ne.s32.totalorder %s53_s0, %s106_s21  ;;  %p112_p12 = scmp.lt.s32.totalorder %s106_s21, %s106_s21 }
  0x1e   :  { %p113_p13 = por %p112_p12, %p111_p11 }
  0x20   :  { %p114_p0 = pnand %p113_p13, %p107_p10 }
  0x8c   :  { %v40_v2 = vpop.permute.xlu0 %39 }
  0x8d   :  { %v43_v3 = vsel %vm42_vm0, %v36_v1, %v40_v2 }
  0x8e   :  { %45 = vst.msk [vmem:[#allocation7] sm:$0x3] %vm44_vm1, %v43_v3 }
  0x8f   :  { %117 = shalt.err (!%p114_p0)
}
  0x90   :  { %55 = dma.vmem_to_hbm [thread:$0]  %s53_s0, 32, %s162_s2, [#allocation4]  }
  0x91   :  { %130 = dma.done.wait [#allocation4], 32  }
  0x92   :  { %131 = vsyncadd [#allocation4], 4294967264 }
  0x93   :  { %59 = vsyncpa [#allocation3], 1 }
  0x94   :  { %60 = vsyncpa [#allocation6], 1 }
  0x95   :  { %61 = vsyncpa [#allocation4], 1 }

</bundles_post_ra>
